<compile_context>
chip_gen: v7x
topology: tpu7x:2x2x1
jax: 0.10.0
libtpu: 0.0.40
codegen_flags: <defaults>
</compile_context>

<pallas_src>
import math

import jax
import jax.numpy as jnp
from jax.experimental import pallas as pl
from jax.experimental.pallas import tpu as pltpu

LANE = 128
SMALL_B = 256          # at/below this, single-shot (no grid) path


def _round_up(n, m):
    return ((n + m - 1) // m) * m


def _pad_axis(a, axis, target):
    pad = target - a.shape[axis]
    if pad == 0:
        return a
    widths = [(0, 0)] * a.ndim
    widths[axis] = (0, pad)
    return jnp.pad(a, widths)


# ----------------------------------------------------------------------------
# One-time parameter packing (hoisted out of the per-step forward).
# ----------------------------------------------------------------------------
def pack_params(w1, b1, w2, b2):
    """w1:(D,H1) b1:(H1,) w2:(H1,C) b2:(C,)  ->  (w1_p, bias, w2_p, C)."""
    H1 = w1.shape[1]
    C = w2.shape[1]
    Hp = _round_up(H1, LANE)                    # padded hidden width (lane-dense)
    Cp = _round_up(C, LANE)                     # padded output width (lane-dense)
    BP = max(Hp, Cp)                            # shared fused-bias width
    w1_p = _pad_axis(w1, 1, Hp).astype(jnp.bfloat16)                      # (D, Hp)
    w2_p = _pad_axis(_pad_axis(w2, 0, Hp), 1, Cp).astype(jnp.bfloat16)    # (Hp, Cp)
    bias = jnp.stack([_pad_axis(b1, 0, BP),                               # row 0: b1
                      _pad_axis(b2, 0, BP)]).astype(jnp.float32)          # row 1: b2
    return w1_p, bias, w2_p, C


def _make_kernel(Hp, Cp):
    def kernel(x_ref, w1_ref, b_ref, w2_ref, o_ref):
        # x arrives as f32 (one HBM read); cast to bf16 in-kernel (VPU slack).
        x_bf = x_ref[...].astype(jnp.bfloat16)
        # hidden = relu(x @ W1 + b1)   (bf16 operands, f32 MXU accumulation)
        h = jnp.dot(x_bf, w1_ref[...], preferred_element_type=jnp.float32)
        h = jnp.maximum(h + b_ref[0:1, :Hp], 0.0)
        # out = hidden @ W2 + b2
        out = jnp.dot(h.astype(jnp.bfloat16), w2_ref[...],
                      preferred_element_type=jnp.float32)
        o_ref[...] = (out + b_ref[1:2, :Cp]).astype(o_ref.dtype)
    return kernel


# ----------------------------------------------------------------------------
# Forward pass
# ----------------------------------------------------------------------------
def net_forward(x, packed, *, tile_b=512):
    """Pallas implementation of Net.forward: fc2(relu(fc1(x))).

    x      : (B, D) float32   (D = 784)
    packed : output of pack_params()
    returns (B, num_classes) float32
    """
    w1_p, bias, w2_p, C = packed
    B, D = x.shape
    Hp = w1_p.shape[1]
    Cp = w2_p.shape[1]
    BP = bias.shape[1]
    kernel = _make_kernel(Hp, Cp)

    if B <= SMALL_B:
        # Tiny batch: single shot, no grid, no pipelining machinery.
        out_p = pl.pallas_call(
            kernel,
            out_shape=jax.ShapeDtypeStruct((B, Cp), jnp.float32),
        )(x, w1_p, bias, w2_p)
        return out_p[:, :C]

    # Large batch: always the batch-tiled, weight-resident pipeline.
    # Shrink the tile so the grid length stays >= 2 (feeds both v7x TCs),
    # keep it a multiple of 128 (256-multiples preferred by the MXU).
    tb = min(tile_b, max(LANE, _round_up((B + 1) // 2, LANE)))
    Bp = _round_up(B, tb)
    x_p = _pad_axis(x, 0, Bp)            # no-op when B is already a multiple

    out_p = pl.pallas_call(
        kernel,
        out_shape=jax.ShapeDtypeStruct((Bp, Cp), jnp.float32),
        grid=(Bp // tb,),
        in_specs=[
            pl.BlockSpec((tb, D), lambda i: (i, 0)),   # x tile (f32, cast in-kernel)
            pl.BlockSpec((D, Hp), lambda i: (0, 0)),   # W1 (VMEM-resident)
            pl.BlockSpec((2, BP), lambda i: (0, 0)),   # fused biases
            pl.BlockSpec((Hp, Cp), lambda i: (0, 0)),  # W2 (VMEM-resident)
        ],
        out_specs=pl.BlockSpec((tb, Cp), lambda i: (i, 0)),
        compiler_params=pltpu.CompilerParams(
            dimension_semantics=("parallel",)),
    )(x_p, w1_p, bias, w2_p)

    return out_p[:B, :C]


# ----------------------------------------------------------------------------
# Deterministic parameter init (mimics nn.Linear's U(-1/sqrt(fan_in), ...))
# ----------------------------------------------------------------------------
def init_linear(key, in_features, out_features, dtype=jnp.float32):
    kw, kb = jax.random.split(key)
    bound = 1.0 / math.sqrt(in_features)
    # stored as (in, out) == W.T relative to PyTorch's (out, in)
    w = jax.random.uniform(kw, (in_features, out_features), dtype,
                           minval=-bound, maxval=bound)
    b = jax.random.uniform(kb, (out_features,), dtype,
                           minval=-bound, maxval=bound)
    return w, b


def _reference(x, w1, b1, w2, b2):
    # Same bf16 quantization as the kernel, f32 accumulation.
    xb = x.astype(jnp.bfloat16).astype(jnp.float32)
    w1b = w1.astype(jnp.bfloat16).astype(jnp.float32)
    w2b = w2.astype(jnp.bfloat16).astype(jnp.float32)
    h = jnp.maximum(xb @ w1b + b1, 0.0)
    return h.astype(jnp.bfloat16).astype(jnp.float32) @ w2b + b2


if __name__ == "__main__":
    # Module hyperparameters (hidden_size1 comes from sys.argv in the original
    # script; pick a small deterministic value here).
    input_size = 28 * 28            # 784
    hidden_size1 = 32
    hidden_size2 = hidden_size1 * 2  # used only by fc3, which forward never calls
    num_classes = 10

    key = jax.random.PRNGKey(0)
    kx1, kx2, kx3, k1, k2, k3 = jax.random.split(key, 6)

    w1, b1 = init_linear(k1, input_size, hidden_size1)
    w2, b2 = init_linear(k2, hidden_size1, num_classes)
    # fc3 exists in __init__ but never participates in forward(); init only
    # for parameter-set parity with the PyTorch module.
    w3, b3 = init_linear(k3, hidden_size2, num_classes)

    packed = pack_params(w1, b1, w2, b2)    # one-time packing

    # --- tiny batch: no-grid single-shot path ---
    batch = 8
    x = jax.random.normal(kx1, (batch, input_size), jnp.float32)
    out = jax.block_until_ready(net_forward(x, packed))
    ref = _reference(x, w1, b1, w2, b2)
    assert out.shape == (batch, num_classes)
    assert jnp.allclose(out, ref, atol=2e-2, rtol=2e-2), \
        float(jnp.max(jnp.abs(out - ref)))

    # --- large batch, divisible by tile: tiled parallel-grid path (grid=2) ---
    batch2 = 1024
    x2 = jax.random.normal(kx2, (batch2, input_size), jnp.float32)
    out2 = jax.block_until_ready(net_forward(x2, packed, tile_b=512))
    ref2 = _reference(x2, w1, b1, w2, b2)
    assert out2.shape == (batch2, num_classes)
    assert jnp.allclose(out2, ref2, atol=2e-2, rtol=2e-2), \
        float(jnp.max(jnp.abs(out2 - ref2)))

    # --- large batch, NOT divisible: padded onto the grid path (no fallback) ---
    batch3 = 384
    x3 = jax.random.normal(kx3, (batch3, input_size), jnp.float32)
    out3 = jax.block_until_ready(net_forward(x3, packed, tile_b=512))
    ref3 = _reference(x3, w1, b1, w2, b2)
    assert out3.shape == (batch3, num_classes)
    assert jnp.allclose(out3, ref3, atol=2e-2, rtol=2e-2), \
        float(jnp.max(jnp.abs(out3 - ref3)))

    print("KERNEL_OK")
</pallas_src>

<mosaic_0001>
module attributes {stable_mosaic.version = 11 : i64} {
  func.func @kernel(%arg0: memref<8x784xf32, #tpu.memory_space<vmem>>, %arg1: memref<784x128xbf16, #tpu.memory_space<vmem>>, %arg2: memref<2x128xf32, #tpu.memory_space<vmem>>, %arg3: memref<128x128xbf16, #tpu.memory_space<vmem>>, %arg4: memref<8x128xf32, #tpu.memory_space<vmem>>) attributes {dimension_semantics = [], scalar_prefetch = 0 : i64, scratch_operands = 0 : i64, tpu.core_type = #tpu.core_type<tc>} {
    %c0 = arith.constant 0 : index
    %c0_0 = arith.constant 0 : index
    %0 = vector.load %arg0[%c0, %c0_0] : memref<8x784xf32, #tpu.memory_space<vmem>>, vector<8x784xf32>
    %1 = arith.truncf %0 : vector<8x784xf32> to vector<8x784xbf16>
    %c0_1 = arith.constant 0 : index
    %c0_2 = arith.constant 0 : index
    %2 = vector.load %arg1[%c0_1, %c0_2] : memref<784x128xbf16, #tpu.memory_space<vmem>>, vector<784x128xbf16>
    %cst = arith.constant dense<0.000000e+00> : vector<8x128xf32>
    %3 = tpu.matmul %1, %2, %cst {dimension_numbers = #tpu.dot_dimension_numbers<[1], [0], [0], [1], [0, 0, 1, 1], [], []>} : vector<8x784xbf16>, vector<784x128xbf16>, vector<8x128xf32> -> vector<8x128xf32>
    %c0_3 = arith.constant 0 : index
    %c0_4 = arith.constant 0 : index
    %4 = vector.load %arg2[%c0_3, %c0_4] : memref<2x128xf32, #tpu.memory_space<vmem>>, vector<1x128xf32>
    %5 = vector.broadcast %4 : vector<1x128xf32> to vector<8x128xf32>
    %6 = arith.addf %3, %5 : vector<8x128xf32>
    %cst_5 = arith.constant 0.000000e+00 : f32
    %7 = vector.broadcast %cst_5 : f32 to vector<8x128xf32>
    %8 = arith.maximumf %6, %7 : vector<8x128xf32>
    %9 = arith.truncf %8 : vector<8x128xf32> to vector<8x128xbf16>
    %c0_6 = arith.constant 0 : index
    %c0_7 = arith.constant 0 : index
    %10 = vector.load %arg3[%c0_6, %c0_7] : memref<128x128xbf16, #tpu.memory_space<vmem>>, vector<128x128xbf16>
    %cst_8 = arith.constant dense<0.000000e+00> : vector<8x128xf32>
    %11 = tpu.matmul %9, %10, %cst_8 {dimension_numbers = #tpu.dot_dimension_numbers<[1], [0], [0], [1], [0, 0, 1, 1], [], []>} : vector<8x128xbf16>, vector<128x128xbf16>, vector<8x128xf32> -> vector<8x128xf32>
    %c1 = arith.constant 1 : index
    %c0_9 = arith.constant 0 : index
    %12 = vector.load %arg2[%c1, %c0_9] : memref<2x128xf32, #tpu.memory_space<vmem>>, vector<1x128xf32>
    %13 = vector.broadcast %12 : vector<1x128xf32> to vector<8x128xf32>
    %14 = arith.addf %11, %13 : vector<8x128xf32>
    %c0_10 = arith.constant 0 : index
    %c0_11 = arith.constant 0 : index
    %15 = vector.load %arg4[%c0_10, %c0_11] : memref<8x128xf32, #tpu.memory_space<vmem>>, vector<8x128xf32>
    tpu.vector_store %arg4[%c0_10, %c0_11], %14 {strides = array<i32>} : memref<8x128xf32, #tpu.memory_space<vmem>>, vector<8x128xf32>,
    return
  }
}

</mosaic_0001>

<bundles_post_ra>
// kernel: tpu_custom_call.1
= control target key start
LH: loop header
LB: loop body
LE: loop exit
PB: predicated region body
PF: predicated region fallthrough
CT: control target
= control target key end

     0   :  { %9 = vsyncpa [#allocation3], 0  ;;  %s1189_s0 = inlined_call_operand.hbm [shape: f32[8,784], index: 0, kind: input, shape index: {}]   ;;  %s1190_s1 = inlined_call_operand.hbm [shape: bf16[784,128], index: 1, kind: input, shape index: {}]   ;;  %s1191_s2 = inlined_call_operand.vmem [shape: f32[2,128], index: 2, kind: input, shape index: {}]   ;;  %s1192_s3 = inlined_call_operand.hbm [shape: bf16[128,128], index: 3, kind: input, shape index: {}]   ;;  %s1193_s4 = inlined_call_operand.hbm [shape: f32[8,128], index: 4, kind: output, shape index: {}]  }
   0x1   :  { %10 = vsyncpa [#allocation6], 0 }
   0x2   :  { %11 = vsyncpa [#allocation4], 0  ;;  %s1083_s15 = smov [#allocation5]   ;;  %s989_s19 = scalar_lea.hbm %s1190_s1, 6272 }
   0x3   :  { %s27_s16 = sshll.u32 %s1083_s15, 4  ;;  %p990_p0 = scmp.ne.s32.totalorder %s1190_s1, %s989_s19  ;;  %s28_s16 = int_to_ptr.vmem [resolvable:$true] %s27_s16 }
   0x4   :  { %p993_p1 = scmp.lt.u32.totalorder %s989_s19, %s1190_s1 }
   0x6   :  { %p995_p2 = pnand %p993_p1, %p990_p0 }
   0x8   :  { %998 = shalt.err (!%p995_p2)
}
   0x9   :  { %s999_s24 = scalar_lea.vmem %s28_s16, 6272  ;;  %p1004_p4 = scmp.lt.s32.totalorder %s28_s16, %s28_s16 }
   0xa   :  { %p1000_p3 = scmp.ne.s32.totalorder %s28_s16, %s999_s24  ;;  %p1005_p5 = scmp.lt.s32.totalorder %s999_s24, %s999_s24 }
   0xc   :  { %p1006_p6 = por %p1005_p5, %p1004_p4 }
   0xe   :  { %p1007_p7 = pnand %p1006_p6, %p1000_p3 }
  0x10   :  { %1010 = shalt.err (!%p1007_p7)
}
  0x11   :  { %s1084_s25 = smov 64   ;;  %s1085_s26 = smov 4  }
  0x12   :  { %33 = dma.hbm_to_vmem [thread:$0]  %s1190_s1, 6272, %s28_s16, [#allocation6], %s1084_s25, %s1084_s25, %s1085_s26  }
  0x13   :  { %s1086_s29 = smov [#allocation2]   ;;  %s1087_s5 = smov [#allocation7]  }
  0x14   :  { %s18_s30 = sshll.u32 %s1086_s29, 4  ;;  %s41_s6 = sshll.u32 %s1087_s5, 4  ;;  %s19_s30 = int_to_ptr.vmem [resolvable:$true] %s18_s30  ;;  %s42_s6 = int_to_ptr.vmem [resolvable:$true] %s41_s6 }
  0x15   :  { %s1011_s9 = scalar_lea.hbm %s1189_s0, 896 }
  0x16   :  { %p1012_p8 = scmp.ne.s32.totalorder %s1189_s0, %s1011_s9  ;;  %p1015_p9 = scmp.lt.u32.totalorder %s1011_s9, %s1189_s0 }
  0x18   :  { %p1017_p10 = pnand %p1015_p9, %p1012_p8 }
  0x1a   :  { %1020 = shalt.err (!%p1017_p10)
}
  0x1b   :  { %s1021_s1 = scalar_lea.vmem %s19_s30, 896  ;;  %p1026_p12 = scmp.lt.s32.totalorder %s19_s30, %s19_s30 }
  0x1c   :  { %p1022_p11 = scmp.ne.s32.totalorder %s19_s30, %s1021_s1  ;;  %p1027_p13 = scmp.lt.s32.totalorder %s1021_s1, %s1021_s1 }
  0x1e   :  { %p1028_p0 = por %p1027_p13, %p1026_p12 }
  0x20   :  { %p1029_p1 = pnand %p1028_p0, %p1022_p11 }
  0x22   :  { %1032 = shalt.err (!%p1029_p1)
}
  0x23   :  { %21 = dma.hbm_to_vmem [thread:$0]  %s1189_s0, 896, %s19_s30, [#allocation3]  }
  0x24   :  { %s1033_s18 = scalar_lea.hbm %s1192_s3, 1024 }
  0x25   :  { %p1034_p2 = scmp.ne.s32.totalorder %s1192_s3, %s1033_s18  ;;  %p1037_p3 = scmp.lt.u32.totalorder %s1033_s18, %s1192_s3 }
  0x27   :  { %p1039_p4 = pnand %p1037_p3, %p1034_p2 }
  0x29   :  { %1042 = shalt.err (!%p1039_p4)
}
  0x2a   :  { %s1043_s23 = scalar_lea.vmem %s42_s6, 1024  ;;  %p1048_p6 = scmp.lt.s32.totalorder %s42_s6, %s42_s6 }
  0x2b   :  { %p1044_p5 = scmp.ne.s32.totalorder %s42_s6, %s1043_s23  ;;  %p1049_p7 = scmp.lt.s32.totalorder %s1043_s23, %s1043_s23 }
  0x2d   :  { %p1050_p8 = por %p1049_p7, %p1048_p6 }
  0x2f   :  { %p1051_p9 = pnand %p1050_p8, %p1044_p5 }
  0x31   :  { %1054 = shalt.err (!%p1051_p9)
}
  0x32   :  { %47 = dma.hbm_to_vmem [thread:$0]  %s1192_s3, 1024, %s42_s6, [#allocation6], %s1084_s25, %s1084_s25, %s1085_s26  }
  0x33   :  { %1077 = dma.done.wait [#allocation3], 896  }
  0x34   :  { %1078 = vsyncadd [#allocation3], 4294966400 }
  0x35   :  { %1079 = dma.done.wait [#allocation6], 7296  }
  0x36   :  { %1080 = vsyncadd [#allocation6], 4294960000  ;;  %v932_v0 = vld [vmem:[#allocation5 + $0x40] sm:$0xff]   ;;  %v936_v4 = vld [vmem:[#allocation5 + $0x48] sm:$0xff]   ;;  %v1088_v44 = vmov 0.0   ;;  %vm1089_vm0 = vmmov 0  }
  0x37   :  { %v933_v1 = vld [vmem:[#allocation5] sm:$0xff]   ;;  %821 = vmatprep.subr.bf16.mxu0 %v932_v0  ;;  %v937_v5 = vld [vmem:[#allocation5 + $0x8] sm:$0xff]   ;;  %v940_v8 = vld [vmem:[#allocation5 + $0x50] sm:$0xff]   ;;  %vm469_vm1 = vcmask 130048   ;;  %s1090_s28 = smov [#allocation8]  }
  0x38   :  { %v934_v2 = vld [vmem:[#allocation5 + $0xc0] sm:$0xff]   ;;  %822 = vmatpush3.bf16.msra.mxu0 %v933_v1  ;;  %v938_v6 = vld [vmem:[#allocation5 + $0xc8] sm:$0xff]   ;;  %v941_v9 = vld [vmem:[#allocation5 + $0x10] sm:$0xff]   ;;  %s751_s29 = sshll.u32 %s1090_s28, 4  ;;  %s752_s29 = int_to_ptr.vmem [resolvable:$true] %s751_s29 }
  0x39   :  { %v935_v3 = vld [vmem:[#allocation5 + $0x80] sm:$0xff]   ;;  %843 = vmatprep.subr.bf16.mxu1 %v934_v2  ;;  %823 = vmatprep.subr.bf16.mxu0 %v936_v4  ;;  %v939_v7 = vld [vmem:[#allocation5 + $0x88] sm:$0xff]   ;;  %v942_v10 = vld [vmem:[#allocation5 + $0xd0] sm:$0xff]   ;;  %s1055_s30 = scalar_lea.vmem %s752_s29, 128  ;;  %p1060_p11 = scmp.lt.s32.totalorder %s752_s29, %s752_s29 }
  0x3a   :  { %844 = vmatpush3.bf16.msra.mxu1 %v935_v3  ;;  %v943_v11 = vld [vmem:[#allocation5 + $0x90] sm:$0xff]   ;;  %v944_v12 = vld [vmem:[#allocation5 + $0x58] sm:$0xff]   ;;  %v948_v16 = vld [vmem:[#allocation5 + $0x60] sm:$0xff]   ;;  %p1056_p10 = scmp.ne.s32.totalorder %s752_s29, %s1055_s30  ;;  %p1061_p12 = scmp.lt.s32.totalorder %s1055_s30, %s1055_s30 }
  0x3b   :  { %845 = vmatprep.subr.bf16.mxu1 %v938_v6  ;;  %v945_v13 = vld [vmem:[#allocation5 + $0x18] sm:$0xff]   ;;  %v949_v17 = vld [vmem:[#allocation5 + $0x20] sm:$0xff]   ;;  %v952_v20 = vld [vmem:[#allocation5 + $0x68] sm:$0xff]  }
  0x3c   :  { %824 = vmatpush3.bf16.msra.mxu0 %v937_v5  ;;  %v946_v14 = vld [vmem:[#allocation5 + $0xd8] sm:$0xff]   ;;  %v950_v18 = vld [vmem:[#allocation5 + $0xe0] sm:$0xff]   ;;  %v953_v21 = vld [vmem:[#allocation5 + $0x28] sm:$0xff]   ;;  %p1062_p13 = por %p1061_p12, %p1060_p11 }
  0x3d   :  { %825 = vmatprep.subr.bf16.mxu0 %v940_v8  ;;  %v947_v15 = vld [vmem:[#allocation5 + $0x98] sm:$0xff]   ;;  %v951_v19 = vld [vmem:[#allocation5 + $0xa0] sm:$0xff]   ;;  %v954_v22 = vld [vmem:[#allocation5 + $0xe8] sm:$0xff]  }
  0x3e   :  { %846 = vmatpush3.bf16.msra.mxu1 %v939_v7  ;;  %v955_v23 = vld [vmem:[#allocation5 + $0xa8] sm:$0xff]   ;;  %v956_v24 = vld [vmem:[#allocation5 + $0x70] sm:$0xff]   ;;  %v960_v28 = vld [vmem:[#allocation5 + $0x78] sm:$0xff]   ;;  %p1063_p0 = pnand %p1062_p13, %p1056_p10 }
  0x3f   :  { %847 = vmatprep.subr.bf16.mxu1 %v942_v10  ;;  %v957_v25 = vld [vmem:[#allocation5 + $0x30] sm:$0xff]   ;;  %v961_v29 = vld [vmem:[#allocation5 + $0x38] sm:$0xff]   ;;  %v58_v34 = vld [vmem:[#allocation2] sm:$0xff] }
  0x40   :  { %826 = vmatpush3.bf16.msra.mxu0 %v941_v9  ;;  %v958_v26 = vld [vmem:[#allocation5 + $0xf0] sm:$0xff]   ;;  %v962_v30 = vld [vmem:[#allocation5 + $0xf8] sm:$0xff]   ;;  %v65_v35 = vpack.c.bf16 %v58_v34, %v58_v34  ;;  %v964_v36 = vld [vmem:[#allocation5 + $0x140] sm:$0xff]  }
  0x41   :  { %827 = vmatprep.subr.bf16.mxu0 %v944_v12  ;;  %v959_v27 = vld [vmem:[#allocation5 + $0xb0] sm:$0xff]   ;;  %v963_v33 = vld [vmem:[#allocation5 + $0xb8] sm:$0xff]   ;;  %v61_v37 = vld [vmem:[#allocation2 + $0x18] sm:$0xff] }
  0x42   :  { %848 = vmatpush3.bf16.msra.mxu1 %v943_v11  ;;  %v59_v31 = vld [vmem:[#allocation2 + $0x8] sm:$0xff]  ;;  %v68_v38 = vpack.c.bf16 %v61_v37, %v61_v37  ;;  %v965_v39 = vld [vmem:[#allocation5 + $0x100] sm:$0xff]   ;;  %v60_v40 = vld [vmem:[#allocation2 + $0x10] sm:$0xff] }
  0x43   :  { %849 = vmatprep.subr.bf16.mxu1 %v946_v14  ;;  %v66_v32 = vpack.c.bf16 %v59_v31, %v59_v31  ;;  %v67_v41 = vpack.c.bf16 %v60_v40, %v60_v40  ;;  %v966_v42 = vld [vmem:[#allocation5 + $0x148] sm:$0xff]   ;;  %v968_v45 = vld [vmem:[#allocation5 + $0x150] sm:$0xff]   ;;  %v970_v47 = vld [vmem:[#allocation5 + $0x158] sm:$0xff]  }
  0x44   :  { %828 = vmatpush3.bf16.msra.mxu0 %v945_v13  ;;  %545 = vmatprep.mubr.bf16.mxu1 %v68_v38  ;;  %v967_v43 = vld [vmem:[#allocation5 + $0x108] sm:$0xff]   ;;  %v969_v46 = vld [vmem:[#allocation5 + $0x110] sm:$0xff]   ;;  %v971_v48 = vld [vmem:[#allocation5 + $0x118] sm:$0xff]  }
  0x45   :  { %829 = vmatprep.subr.bf16.mxu0 %v948_v16  ;;  %505 = vmatprep.mubr.bf16.mxu0 %v66_v32  ;;  %v972_v49 = vld [vmem:[#allocation5 + $0x160] sm:$0xff]   ;;  %v974_v51 = vld [vmem:[#allocation5 + $0x168] sm:$0xff]   ;;  %v63_v54 = vld [vmem:[#allocation2 + $0x28] sm:$0xff] }
  0x46   :  { %850 = vmatpush3.bf16.msra.mxu1 %v947_v15  ;;  %v973_v50 = vld [vmem:[#allocation5 + $0x120] sm:$0xff]   ;;  %v975_v52 = vld [vmem:[#allocation5 + $0x128] sm:$0xff]   ;;  %v976_v55 = vld [vmem:[#allocation5 + $0x170] sm:$0xff]   ;;  %v70_v56 = vpack.c.bf16 %v63_v54, %v63_v54 }
  0x47   :  { %851 = vmatprep.subr.bf16.mxu1 %v950_v18  ;;  %v980_v53 = vld [vmem:[#allocation5 + $0x180] sm:$0xff]   ;;  %v64_v57 = vld [vmem:[#allocation2 + $0x30] sm:$0xff]  ;;  %v977_v59 = vld [vmem:[#allocation5 + $0x130] sm:$0xff]  }
  0x48   :  { %830 = vmatpush3.bf16.msra.mxu0 %v949_v17  ;;  %v71_v58 = vpack.c.bf16 %v64_v57, %v64_v57  ;;  %v978_v60 = vld [vmem:[#allocation5 + $0x178] sm:$0xff]   ;;  %v62_v62 = vld [vmem:[#allocation2 + $0x20] sm:$0xff]  ;;  %v982_v1 = vld [vmem:[#allocation7 + $0x8] sm:$0xff]  }
  0x49   :  { %831 = vmatprep.subr.bf16.mxu0 %v952_v20  ;;  %v979_v61 = vld [vmem:[#allocation5 + $0x138] sm:$0xff]   ;;  %v69_v63 = vpack.c.bf16 %v62_v62, %v62_v62  ;;  %v981_v0 = vld [vmem:[#allocation7] sm:$0xff]   ;;  %v984_v3 = vld [vmem:[#allocation7 + $0x18] sm:$0xff]  }
  0x4a   :  { %852 = vmatpush3.bf16.msra.mxu1 %v951_v19  ;;  %v983_v2 = vld [vmem:[#allocation7 + $0x10] sm:$0xff]   ;;  %v985_v4 = vld [vmem:[#allocation7 + $0x20] sm:$0xff]   ;;  %v986_v5 = vld [vmem:[#allocation7 + $0x28] sm:$0xff]  }
  0x4b   :  { %853 = vmatprep.subr.bf16.mxu1 %v954_v22  ;;  %v987_v6 = vld [vmem:[#allocation7 + $0x30] sm:$0xff]   ;;  %v988_v7 = vld [vmem:[#allocation7 + $0x38] sm:$0xff]   ;;  %v761_v9 = vld [vmem:[%s1191_s2] ss:$0 sm:$0xff] }
  0x4c   :  { %832 = vmatpush3.bf16.msra.mxu0 %v953_v21  ;;  %v812_v34 = vld [vmem:[%s1191_s2 + $0x1] ss:$0 sm:$0xff] }
  0x4d   :  { %833 = vmatprep.subr.bf16.mxu0 %v956_v24 }
  0x4e   :  { %854 = vmatpush3.bf16.msra.mxu1 %v955_v23 }
  0x4f   :  { %855 = vmatprep.subr.bf16.mxu1 %v958_v26 }
  0x50   :  { %834 = vmatpush3.bf16.msra.mxu0 %v957_v25 }
  0x51   :  { %835 = vmatprep.subr.bf16.mxu0 %v960_v28 }
  0x52   :  { %856 = vmatpush3.bf16.msra.mxu1 %v959_v27 }
  0x53   :  { %857 = vmatprep.subr.bf16.mxu1 %v962_v30 }
  0x54   :  { %836 = vmatpush3.bf16.msra.mxu0 %v961_v29 }
  0x55   :  { %865 = vmatprep.subr.bf16.mxu0 %v964_v36 }
  0x56   :  { %858 = vmatpush3.bf16.msra.mxu1 %v963_v33 }
  0x57   :  { %506 = vmatmul.mubr.bf16.vlgmr.msra.gmra.mrb[0].mxu0 %v65_v35  ;;  %898 = vmatprep.subr.bf16.mxu1 %v1088_v44 }
  0x58   :  { %866 = vmatpush3.bf16.msra.mxu0 %v965_v39  ;;  %585 = vmatprep.mubr.bf16.mxu0 %v70_v56 }
  0x59   :  { %546 = vmatmul.mubr.bf16.vlgmr.msra.gmra.mrb[0].mxu1 %v67_v41  ;;  %867 = vmatprep.subr.bf16.mxu0 %v966_v42 }
  0x5a   :  { %900 = vmatprep.mubr.msk.bf16.mxu1 %vm1089_vm0, %v1088_v44  ;;  %899 = vmatpush3.bf16.msra.mxu1 %v980_v53 }
  0x5b   :  { %904 = vmatprep.subr.bf16.mxu1 %v1088_v44 }
  0x5c   :  { %868 = vmatpush3.bf16.msra.mxu0 %v967_v43 }
  0x5d   :  { %869 = vmatprep.subr.bf16.mxu0 %v968_v45 }
  0x60   :  { %870 = vmatpush3.bf16.msra.mxu0 %v969_v46 }
  0x61   :  { %871 = vmatprep.subr.bf16.mxu0 %v970_v47  ;;  %901 = vmatmul.mubr.msk.bf16.vlgmr.msra.gmra.mrb[4].mxu1 %vm469_vm1, %v71_v58 }
  0x62   :  { %920 = vmatprep.mubr.msk.bf16.mxu1 %vm1089_vm0, %v1088_v44  ;;  %905 = vmatpush3.bf16.msra.mxu1 %v981_v0 }
  0x63   :  { %906 = vmatprep.subr.bf16.mxu1 %v1088_v44 }
  0x64   :  { %872 = vmatpush3.bf16.msra.mxu0 %v971_v48 }
  0x65   :  { %873 = vmatprep.subr.bf16.mxu0 %v972_v49 }
  0x66   :  { %907 = vmatpush3.bf16.msra.mxu1 %v982_v1 }
  0x67   :  { %908 = vmatprep.subr.bf16.mxu1 %v1088_v44 }
  0x68   :  { %874 = vmatpush3.bf16.msra.mxu0 %v973_v50 }
  0x69   :  { %875 = vmatprep.subr.bf16.mxu0 %v974_v51 }
  0x6a   :  { %909 = vmatpush3.bf16.msra.mxu1 %v983_v2 }
  0x6b   :  { %910 = vmatprep.subr.bf16.mxu1 %v1088_v44 }
  0x6c   :  { %876 = vmatpush3.bf16.msra.mxu0 %v975_v52 }
  0x6d   :  { %877 = vmatprep.subr.bf16.mxu0 %v976_v55 }
  0x6e   :  { %911 = vmatpush3.bf16.msra.mxu1 %v984_v3 }
  0x6f   :  { %912 = vmatprep.subr.bf16.mxu1 %v1088_v44 }
  0x70   :  { %878 = vmatpush3.bf16.msra.mxu0 %v977_v59 }
  0x71   :  { %879 = vmatprep.subr.bf16.mxu0 %v978_v60 }
  0x72   :  { %913 = vmatpush3.bf16.msra.mxu1 %v985_v4 }
  0x73   :  { %914 = vmatprep.subr.bf16.mxu1 %v1088_v44 }
  0x74   :  { %880 = vmatpush3.bf16.msra.mxu0 %v979_v61 }
  0x76   :  { %915 = vmatpush3.bf16.msra.mxu1 %v986_v5 }
  0x77   :  { %586 = vmatmul.mubr.bf16.vlgmr.msra.gmra.mrb[4].mxu0 %v69_v63  ;;  %916 = vmatprep.subr.bf16.mxu1 %v1088_v44 }
  0x7a   :  { %917 = vmatpush3.bf16.msra.mxu1 %v987_v6 }
  0x7b   :  { %918 = vmatprep.subr.bf16.mxu1 %v1088_v44 }
  0x7e   :  { %919 = vmatpush3.bf16.msra.mxu1 %v988_v7 }
 0x12a   :  { %v837_v8 = vpop.f32.mrb[0].mxu0 }
 0x12b   :  { %v838_v10 = vpop.f32.mrb[1].mxu0 }
 0x12c   :  { %v839_v11 = vadd.f32 %v838_v10, %v837_v8  ;;  %v840_v12 = vpop.f32.mrb[2].mxu0  ;;  %v859_v13 = vpop.f32.mrb[0].mxu1 }
 0x12d   :  { %v841_v14 = vpop.f32.mrb[3].mxu0  ;;  %v860_v16 = vpop.f32.mrb[1].mxu1 }
 0x12e   :  { %v508_v15 = vadd.f32 %v839_v11, %v761_v9  ;;  %v861_v17 = vadd.f32 %v860_v16, %v859_v13  ;;  %v862_v18 = vpop.f32.mrb[2].mxu1 }
 0x12f   :  { %v863_v19 = vpop.f32.mrb[3].mxu1 }
 0x130   :  { %v548_v20 = vadd.f32 %v861_v17, %v508_v15 }
 0x134   :  { %v627_v21 = vpop.f32.mrb[4].mxu1 }
 0x135   :  { %v902_v22 = vpop.f32.mrb[5].mxu1 }
 0x136   :  { %v630_v23 = vpop.f32.mrb[6].mxu1 }
 0x137   :  { %v903_v24 = vpop.f32.mrb[7].mxu1 }
 0x14a   :  { %v881_v25 = vpop.f32.mrb[4].mxu0 }
 0x14b   :  { %v882_v26 = vpop.f32.mrb[5].mxu0 }
 0x14c   :  { %v883_v27 = vadd.f32 %v882_v26, %v881_v25  ;;  %v884_v28 = vpop.f32.mrb[6].mxu0 }
 0x14d   :  { %v885_v29 = vpop.f32.mrb[7].mxu0 }
 0x14e   :  { %v588_v30 = vadd.f32 %v883_v27, %v548_v20 }
 0x150   :  { %v628_v31 = vadd.f32 %v627_v21, %v588_v30 }
 0x152   :  { %v633_v32 = vmax.f32 %v628_v31, 0.0 }
 0x154   :  { %v634_v33 = vpack.c.bf16 %v633_v32, %v633_v32 }
 0x156   :  { %921 = vmatmul.mubr.bf16.vlgmr.msra.gmra.mrb[8].mxu1 %v634_v33 }
 0x229   :  { %v738_v35 = vpop.f32.mrb[8].mxu1 }
 0x22a   :  { %v739_v36 = vadd.f32 %v812_v34, %v738_v35  ;;  %v922_v37 = vpop.f32.mrb[9].mxu1 }
 0x22b   :  { %v741_v38 = vpop.f32.mrb[10].mxu1 }
 0x22c   :  { %744 = vst [vmem:[#allocation8] sm:$0xff] %v739_v36  ;;  %v923_v39 = vpop.f32.mrb[11].mxu1 }
 0x22d   :  { %1066 = shalt.err (!%p1063_p0)
}
 0x22e   :  { %s1067_s2 = scalar_lea.hbm %s1193_s4, 128 }
 0x22f   :  { %p1068_p1 = scmp.ne.s32.totalorder %s1193_s4, %s1067_s2  ;;  %p1071_p2 = scmp.lt.u32.totalorder %s1067_s2, %s1193_s4 }
 0x231   :  { %p1073_p3 = pnand %p1071_p2, %p1068_p1 }
 0x233   :  { %1076 = shalt.err (!%p1073_p3)
}
 0x234   :  { %754 = dma.vmem_to_hbm [thread:$0]  %s752_s29, 128, %s1193_s4, [#allocation4]  }
 0x235   :  { %1081 = dma.done.wait [#allocation4], 128  }
 0x236   :  { %1082 = vsyncadd [#allocation4], 4294967168 }
 0x237   :  { %758 = vsyncpa [#allocation3], 1 }
 0x238   :  { %759 = vsyncpa [#allocation6], 1 }
 0x239   :  { %760 = vsyncpa [#allocation4], 1 }

</bundles_post_ra>
